<compile_context>
chip_gen: v7x
topology: tpu7x:2x2x1
jax: 0.10.0
libtpu: 0.0.40
codegen_flags: <defaults>
</compile_context>

<pallas_src>
from functools import partial

import jax
import jax.numpy as jnp
from jax.experimental import pallas as pl
from jax.experimental.pallas import tpu as pltpu


# ----------------------------------------------------------------------------
# Kernel: one batch tile per grid step, batch on lanes.
#   xt_ref : (n_input, TB)       activations tile (transposed input)
#   w*_ref : PyTorch [out, in]   VMEM-resident weights
#   b*_ref : (out, 1)            VMEM-resident biases (f32)
#   ot_ref : (n_output, TB)      lane-dense output tile
# ----------------------------------------------------------------------------
def mlp_kernel(xt_ref, w1_ref, b1_ref, w2_ref, b2_ref, w3_ref, b3_ref, ot_ref):
    mdt = w1_ref.dtype                 # matmul operand dtype (bf16 or f32)
    xt = xt_ref[...]                   # (n_input, TB)

    # Hoisted single reads of the biases (kept f32 for VPU add / ReLU).
    b1 = b1_ref[...]                   # (H, 1) broadcasts along lanes
    b2 = b2_ref[...]
    b3 = b3_ref[...]

    # hidden1 + relu   :: (H, n_in) @ (n_in, TB) -> (H, TB), f32 acc on MXU
    h1 = jnp.dot(w1_ref[...], xt, preferred_element_type=jnp.float32) + b1
    h1 = jnp.maximum(h1, 0.0)

    # hidden2 + relu
    h2 = jnp.dot(w2_ref[...], h1.astype(mdt),
                 preferred_element_type=jnp.float32) + b2
    h2 = jnp.maximum(h2, 0.0)

    # predict (no activation); written lane-dense across the batch axis
    out = jnp.dot(w3_ref[...], h2.astype(mdt),
                  preferred_element_type=jnp.float32) + b3
    ot_ref[...] = out.astype(ot_ref.dtype)


# ----------------------------------------------------------------------------
# Per-generation tile sizing.
# ----------------------------------------------------------------------------
def _vmem_capacity_bytes():
    try:
        return int(pltpu.get_tpu_info().vmem_capacity_bytes)
    except Exception:
        return 64 << 20          # conservative default (v7x per-TC VMEM)


def _pick_batch_tile(batch):
    vmem = _vmem_capacity_bytes()
    # v5e / v6e: 128 MiB VMEM -> bigger tile; v7x: 64 MiB -> smaller tile.
    tb = 1024 if vmem >= (96 << 20) else 512      # both multiples of 256 (and 128)
    padded = pl.cdiv(batch, 128) * 128
    return min(tb, max(128, padded))


# ----------------------------------------------------------------------------
# Wrapper: x is [B, n_input]; params hold PyTorch-layout weights/biases.
# ----------------------------------------------------------------------------
def net_forward(x, params, *, use_bf16=True, batch_tile=None):
    w1, b1, w2, b2, w3, b3 = (params["w1"], params["b1"], params["w2"],
                              params["b2"], params["w3"], params["b3"])
    B, n_input = x.shape
    n_output = w3.shape[0]

    TB = batch_tile if batch_tile is not None else _pick_batch_tile(B)
    TB = max(128, (TB // 128) * 128)              # lane alignment
    B_pad = pl.cdiv(B, TB) * TB

    # Pad batch and transpose so batch sits on the lane axis.
    x_pad = jnp.pad(x, ((0, B_pad - B), (0, 0)))
    xt = x_pad.T                                   # (n_input, B_pad)

    mdt = jnp.bfloat16 if use_bf16 else jnp.float32
    xt = xt.astype(mdt)
    w1c, w2c, w3c = (w.astype(mdt) for w in (w1, w2, w3))   # cast ONCE, outside kernel

    resident = lambda a: pl.BlockSpec(a.shape, lambda i: (0,) * a.ndim)

    out_t = pl.pallas_call(
        mlp_kernel,
        out_shape=jax.ShapeDtypeStruct((n_output, B_pad), x.dtype),
        grid=(B_pad // TB,),
        in_specs=[
            pl.BlockSpec((n_input, TB), lambda i: (0, i)),   # streamed activations
            resident(w1c), resident(b1),                     # VMEM-resident params
            resident(w2c), resident(b2),
            resident(w3c), resident(b3),
        ],
        out_specs=pl.BlockSpec((n_output, TB), lambda i: (0, i)),  # lane-dense out
        compiler_params=pltpu.CompilerParams(
            dimension_semantics=("parallel",),     # shard batch across v7x's 2 TCs
            vmem_limit_bytes=32 << 20,
        ),
    )(xt, w1c, b1, w2c, b2, w3c, b3)

    return out_t[:, :B].T                          # back to (B, n_output)


# ----------------------------------------------------------------------------
# Param init mimicking PyTorch nn.Linear default (U[-1/sqrt(fan_in), +]).
# Weights kept in native [out, in] layout, biases as [out, 1].
# ----------------------------------------------------------------------------
def init_params(key, n_input, n_hidden, n_output):
    def linear(k, fan_in, fan_out):
        kw, kb = jax.random.split(k)
        bound = 1.0 / jnp.sqrt(jnp.float32(fan_in))
        w = jax.random.uniform(kw, (fan_out, fan_in), jnp.float32, -bound, bound)
        b = jax.random.uniform(kb, (fan_out, 1), jnp.float32, -bound, bound)
        return w, b

    k1, k2, k3 = jax.random.split(key, 3)
    w1, b1 = linear(k1, n_input, n_hidden)
    w2, b2 = linear(k2, n_hidden, n_hidden)
    w3, b3 = linear(k3, n_hidden, n_output)
    return {"w1": w1, "b1": b1, "w2": w2, "b2": b2, "w3": w3, "b3": b3}


def reference_forward(x, p):
    h1 = jnp.maximum(x @ p["w1"].T + p["b1"].T, 0.0)
    h2 = jnp.maximum(h1 @ p["w2"].T + p["b2"].T, 0.0)
    return h2 @ p["w3"].T + p["b3"].T


if __name__ == "__main__":
    key = jax.random.PRNGKey(0)
    k_x, k_p, k_x2 = jax.random.split(key, 3)

    n_input, n_hidden, n_output = 4, 32, 1
    params = init_params(k_p, n_input, n_hidden, n_output)

    # 1) Small batch, f32 matmul operands -> tight check vs reference.
    x_small = jax.random.normal(k_x, (8, n_input), dtype=jnp.float32)
    out_f32 = jax.block_until_ready(net_forward(x_small, params, use_bf16=False))
    ref_f32 = reference_forward(x_small, params)
    assert out_f32.shape == (8, n_output)
    assert jnp.allclose(out_f32, ref_f32, atol=1e-4, rtol=1e-4), "f32 mismatch vs reference"

    # 2) Larger, non-multiple batch with bf16 operands and a small explicit tile
    #    so the grid has >1 step (exercises tiling / padding / parallel path).
    x_big = jax.random.normal(k_x2, (300, n_input), dtype=jnp.float32)
    out_bf16 = jax.block_until_ready(
        net_forward(x_big, params, use_bf16=True, batch_tile=128))
    ref_big = reference_forward(x_big, params)
    assert out_bf16.shape == (300, n_output)
    assert jnp.allclose(out_bf16, ref_big, atol=5e-2, rtol=5e-2), "bf16 mismatch vs reference"

    print("KERNEL_OK")
</pallas_src>

<mosaic_0001>
module attributes {stable_mosaic.version = 11 : i64} {
  func.func @mlp_kernel(%arg0: i32, %arg1: memref<4x128xf32, #tpu.memory_space<vmem>>, %arg2: memref<32x4xf32, #tpu.memory_space<vmem>>, %arg3: memref<32x1xf32, #tpu.memory_space<vmem>>, %arg4: memref<32x32xf32, #tpu.memory_space<vmem>>, %arg5: memref<32x1xf32, #tpu.memory_space<vmem>>, %arg6: memref<1x32xf32, #tpu.memory_space<vmem>>, %arg7: memref<1x1xf32, #tpu.memory_space<vmem>>, %arg8: memref<1x128xf32, #tpu.memory_space<vmem>>) attributes {dimension_semantics = [#tpu.dimension_semantics<parallel>], iteration_bounds = array<i64: 1>, scalar_prefetch = 0 : i64, scratch_operands = 0 : i64, tpu.core_type = #tpu.core_type<tc>, window_params = [{transform_indices = @transform_0, window_bounds = array<i64: 4, 128>}, {pipeline_mode = #tpu.pipeline_mode<synchronous>, transform_indices = @transform_1, window_bounds = array<i64: 32, 4>}, {pipeline_mode = #tpu.pipeline_mode<synchronous>, transform_indices = @transform_2, window_bounds = array<i64: 32, 1>}, {pipeline_mode = #tpu.pipeline_mode<synchronous>, transform_indices = @transform_3, window_bounds = array<i64: 32, 32>}, {pipeline_mode = #tpu.pipeline_mode<synchronous>, transform_indices = @transform_4, window_bounds = array<i64: 32, 1>}, {pipeline_mode = #tpu.pipeline_mode<synchronous>, transform_indices = @transform_5, window_bounds = array<i64: 1, 32>}, {pipeline_mode = #tpu.pipeline_mode<synchronous>, transform_indices = @transform_6, window_bounds = array<i64: 1, 1>}, {transform_indices = @transform_7, window_bounds = array<i64: 1, 128>}]} {
    %c0 = arith.constant 0 : index
    %c0_0 = arith.constant 0 : index
    %0 = vector.load %arg1[%c0, %c0_0] : memref<4x128xf32, #tpu.memory_space<vmem>>, vector<4x128xf32>
    %c0_1 = arith.constant 0 : index
    %c0_2 = arith.constant 0 : index
    %1 = vector.load %arg3[%c0_1, %c0_2] : memref<32x1xf32, #tpu.memory_space<vmem>>, vector<32x1xf32>
    %c0_3 = arith.constant 0 : index
    %c0_4 = arith.constant 0 : index
    %2 = vector.load %arg5[%c0_3, %c0_4] : memref<32x1xf32, #tpu.memory_space<vmem>>, vector<32x1xf32>
    %c0_5 = arith.constant 0 : index
    %c0_6 = arith.constant 0 : index
    %3 = vector.load %arg7[%c0_5, %c0_6] : memref<1x1xf32, #tpu.memory_space<vmem>>, vector<1x1xf32>
    %c0_7 = arith.constant 0 : index
    %c0_8 = arith.constant 0 : index
    %4 = vector.load %arg2[%c0_7, %c0_8] : memref<32x4xf32, #tpu.memory_space<vmem>>, vector<32x4xf32>
    %cst = arith.constant dense<0.000000e+00> : vector<32x128xf32>
    %5 = tpu.matmul %4, %0, %cst {dimension_numbers = #tpu.dot_dimension_numbers<[1], [0], [0], [1], [0, 0, 1, 1], [], []>} : vector<32x4xf32>, vector<4x128xf32>, vector<32x128xf32> -> vector<32x128xf32>
    %6 = vector.broadcast %1 : vector<32x1xf32> to vector<32x128xf32>
    %7 = arith.addf %5, %6 : vector<32x128xf32>
    %cst_9 = arith.constant 0.000000e+00 : f32
    %8 = vector.broadcast %cst_9 : f32 to vector<32x128xf32>
    %9 = arith.maximumf %7, %8 : vector<32x128xf32>
    %c0_10 = arith.constant 0 : index
    %c0_11 = arith.constant 0 : index
    %10 = vector.load %arg4[%c0_10, %c0_11] : memref<32x32xf32, #tpu.memory_space<vmem>>, vector<32x32xf32>
    %cst_12 = arith.constant dense<0.000000e+00> : vector<32x128xf32>
    %11 = tpu.matmul %10, %9, %cst_12 {dimension_numbers = #tpu.dot_dimension_numbers<[1], [0], [0], [1], [0, 0, 1, 1], [], []>} : vector<32x32xf32>, vector<32x128xf32>, vector<32x128xf32> -> vector<32x128xf32>
    %12 = vector.broadcast %2 : vector<32x1xf32> to vector<32x128xf32>
    %13 = arith.addf %11, %12 : vector<32x128xf32>
    %cst_13 = arith.constant 0.000000e+00 : f32
    %14 = vector.broadcast %cst_13 : f32 to vector<32x128xf32>
    %15 = arith.maximumf %13, %14 : vector<32x128xf32>
    %c0_14 = arith.constant 0 : index
    %c0_15 = arith.constant 0 : index
    %16 = vector.load %arg6[%c0_14, %c0_15] : memref<1x32xf32, #tpu.memory_space<vmem>>, vector<1x32xf32>
    %cst_16 = arith.constant dense<0.000000e+00> : vector<1x128xf32>
    %17 = tpu.matmul %16, %15, %cst_16 {dimension_numbers = #tpu.dot_dimension_numbers<[1], [0], [0], [1], [0, 0, 1, 1], [], []>} : vector<1x32xf32>, vector<32x128xf32>, vector<1x128xf32> -> vector<1x128xf32>
    %18 = vector.broadcast %3 : vector<1x1xf32> to vector<1x128xf32>
    %19 = arith.addf %17, %18 : vector<1x128xf32>
    %c0_17 = arith.constant 0 : index
    %c0_18 = arith.constant 0 : index
    %20 = vector.load %arg8[%c0_17, %c0_18] : memref<1x128xf32, #tpu.memory_space<vmem>>, vector<1x128xf32>
    tpu.vector_store %arg8[%c0_17, %c0_18], %19 {strides = array<i32>} : memref<1x128xf32, #tpu.memory_space<vmem>>, vector<1x128xf32>,
    return
  }
  func.func @transform_0(%arg0: i32) -> (i32, i32) {
    %c0_i32 = arith.constant 0 : i32
    %c0_i32_0 = arith.constant 0 : i32
    return %c0_i32, %arg0 : i32, i32
  }
  func.func @transform_1(%arg0: i32) -> (i32, i32) {
    %c0_i32 = arith.constant 0 : i32
    %c0_i32_0 = arith.constant 0 : i32
    %c0_i32_1 = arith.constant 0 : i32
    return %c0_i32, %c0_i32_0 : i32, i32
  }
  func.func @transform_2(%arg0: i32) -> (i32, i32) {
    %c0_i32 = arith.constant 0 : i32
    %c0_i32_0 = arith.constant 0 : i32
    %c0_i32_1 = arith.constant 0 : i32
    return %c0_i32, %c0_i32_0 : i32, i32
  }
  func.func @transform_3(%arg0: i32) -> (i32, i32) {
    %c0_i32 = arith.constant 0 : i32
    %c0_i32_0 = arith.constant 0 : i32
    %c0_i32_1 = arith.constant 0 : i32
    return %c0_i32, %c0_i32_0 : i32, i32
  }
  func.func @transform_4(%arg0: i32) -> (i32, i32) {
    %c0_i32 = arith.constant 0 : i32
    %c0_i32_0 = arith.constant 0 : i32
    %c0_i32_1 = arith.constant 0 : i32
    return %c0_i32, %c0_i32_0 : i32, i32
  }
  func.func @transform_5(%arg0: i32) -> (i32, i32) {
    %c0_i32 = arith.constant 0 : i32
    %c0_i32_0 = arith.constant 0 : i32
    %c0_i32_1 = arith.constant 0 : i32
    return %c0_i32, %c0_i32_0 : i32, i32
  }
  func.func @transform_6(%arg0: i32) -> (i32, i32) {
    %c0_i32 = arith.constant 0 : i32
    %c0_i32_0 = arith.constant 0 : i32
    %c0_i32_1 = arith.constant 0 : i32
    return %c0_i32, %c0_i32_0 : i32, i32
  }
  func.func @transform_7(%arg0: i32) -> (i32, i32) {
    %c0_i32 = arith.constant 0 : i32
    %c0_i32_0 = arith.constant 0 : i32
    return %c0_i32, %arg0 : i32, i32
  }
}

</mosaic_0001>

<bundles_post_ra>
// kernel: tpu_custom_call.1
= control target key start
LH: loop header
LB: loop body
LE: loop exit
PB: predicated region body
PF: predicated region fallthrough
CT: control target
= control target key end

     0   :  { %s622_s0 = inlined_call_operand.vmem [shape: f32[4,128], index: 0, kind: input, shape index: {}]   ;;  %s623_s1 = inlined_call_operand.vmem [shape: f32[32,4], index: 1, kind: input, shape index: {}]   ;;  %s624_s2 = inlined_call_operand.vmem [shape: f32[32,1], index: 2, kind: input, shape index: {}]   ;;  %s625_s3 = inlined_call_operand.vmem [shape: f32[32,32], index: 3, kind: input, shape index: {}]   ;;  %s626_s4 = inlined_call_operand.vmem [shape: f32[32,1], index: 4, kind: input, shape index: {}]   ;;  %s627_s5 = inlined_call_operand.vmem [shape: f32[1,32], index: 5, kind: input, shape index: {}]   ;;  %s628_s6 = inlined_call_operand.<no memory space> [shape: f32[1,1], index: 6, kind: input, shape index: {}]   ;;  %s629_s7 = inlined_call_operand.hbm [shape: f32[1,128], index: 7, kind: output, shape index: {}]  }
   0x1   :  { %v12_v0 = vstv %s628_s6 }
   0x2   :  { %13 = vst [vmem:[#allocation2] sm:$0x1] %v12_v0 }
   0x3   :  { %v29_v1 = vld [vmem:[%s622_s0] sm:$0xf]  ;;  %vm76_vm0 = vcmask 1043456   ;;  %vm63_vm1 = vcmask 31744   ;;  %v40_v3 = vld [vmem:[%s623_s1 + $0x8] sm:$0xff]  ;;  %v41_v4 = vld [vmem:[%s623_s1 + $0x10] sm:$0xff] }
   0x4   :  { %v39_v2 = vld [vmem:[%s623_s1] sm:$0xff]  ;;  %421 = vmatprep.subr.msk.mxu0 %vm76_vm0, %v29_v1  ;;  %v499_v6 = vmov 0   ;;  %v32_v7 = vld [vmem:[%s624_s2 + $0x10] sm:$0xff]  ;;  %v42_v8 = vld [vmem:[%s623_s1 + $0x18] sm:$0xff] }
   0x5   :  { %423 = vmatprep.mubr.msk.f32.mxu0 %vm63_vm1, %v39_v2  ;;  %v30_v5 = vld [vmem:[%s624_s2] sm:$0xff]  ;;  %422 = vmatpush3.msk.msra.mxu0 %vm76_vm0, %v29_v1  ;;  %v31_v9 = vld [vmem:[%s624_s2 + $0x8] sm:$0xff] }
   0x6   :  { %473 = vset.pattern.permute.xlu0 %v499_v6  ;;  %424 = vmatmul.mubr.msk.f32.vlgmr.msra.gmra.mrb[0].mxu0 %vm63_vm1, %v40_v3 }
   0x7   :  { %45 = vperm.xlu0 %473, %v30_v5   ;;  %426 = vmatprep.mubr.msk.f32.mxu0 %vm63_vm1, %v41_v4 }
   0x8   :  { %474 = vset.pattern.permute.xlu1 %v499_v6 }
   0x9   :  { %14 = vsyncpa [#allocation4], 0  ;;  %55 = vperm.xlu1 %474, %v32_v7   ;;  %v33_v10 = vld [vmem:[%s624_s2 + $0x18] sm:$0xff]  ;;  %v34_v11 = vld [vmem:[%s626_s4] sm:$0xff]  ;;  %vm193_vm2 = vcmask 261120   ;;  %v500_v38 = vmov 0.0|0.0   ;;  %v301_v59 = vlaneseq }
   0xa   :  { %427 = vmatmul.mubr.msk.f32.gmra.mrb[2].mxu0 %vm63_vm1, %v42_v8  ;;  %v35_v12 = vld [vmem:[%s626_s4 + $0x8] sm:$0xff]  ;;  %v36_v13 = vld [vmem:[%s626_s4 + $0x10] sm:$0xff]  ;;  %v37_v14 = vld [vmem:[%s626_s4 + $0x18] sm:$0xff]  ;;  %462 = vmatprep.subr.bf16.mxu0 %v500_v38  ;;  %vm501_vm3 = vmmov 0   ;;  %v502_v39 = vmov 0.0   ;;  %s503_s6 = smov [#allocation3]  }
   0xb   :  { %50 = vperm.xlu0 %473, %v31_v9   ;;  %v38_v15 = vld [vmem:[#allocation2] sm:$0x1]  ;;  %v170_v35 = vld [vmem:[%s625_s3 + $0x8] sm:$0xff]  ;;  %v171_v36 = vld [vmem:[%s625_s3 + $0x10] sm:$0xff]  ;;  %451 = vmatprep.mubr.msk.f32.mxu0 %vm501_vm3, %v502_v39  ;;  %v302_v60 = vshrl.u32 %v301_v59, 7  ;;  %s385_s10 = sshll.u32 %s503_s6, 4  ;;  %s386_s10 = int_to_ptr.vmem [resolvable:$true] %s385_s10 }
   0xc   :  { %v169_v16 = vld [vmem:[%s625_s3] sm:$0xff]  ;;  %v172_v37 = vld [vmem:[%s625_s3 + $0x18] sm:$0xff]  ;;  %s475_s11 = scalar_lea.vmem %s386_s10, 16  ;;  %s479_s0 = scalar_lea.vmem %s386_s10, 32 }
   0xd   :  { %60 = vperm.xlu1 %474, %v33_v10   ;;  %437 = vmatprep.mubr.msk.f32.mxu1 %vm193_vm2, %v169_v16  ;;  %v295_v58 = vld [vmem:[%s627_s5] sm:$0x1]  ;;  %v303_v61 = vsub.s32 0, %v302_v60  ;;  %p476_p0 = scmp.ne.s32.totalorder %s386_s10, %s475_s11  ;;  %p480_p1 = scmp.lt.s32.totalorder %s386_s10, %s386_s10 }
   0xe   :  { %p481_p2 = scmp.lt.s32.totalorder %s479_s0, %s475_s11 }
   0xf   :  { %175 = vperm.xlu0 %473, %v34_v11  }
  0x10   :  { %p482_p3 = por %p481_p2, %p480_p1 }
  0x11   :  { %180 = vperm.xlu1 %474, %v35_v12  }
  0x12   :  { %p483_p4 = pnand %p482_p3, %p476_p0 }
  0x13   :  { %185 = vperm.xlu0 %473, %v36_v13  }
  0x15   :  { %190 = vperm.xlu1 %474, %v37_v14  }
  0x17   :  { %298 = vperm.xlu0 %473, %v38_v15  }
  0x86   :  { %v46_v17 = vpop.permute.xlu0 %45 }
  0x88   :  { %v56_v18 = vpop.permute.xlu1 %55 }
  0x8a   :  { %v51_v19 = vpop.permute.xlu0 %50 }
  0x8c   :  { %v61_v25 = vpop.permute.xlu1 %60 }
  0x8e   :  { %v176_v41 = vpop.permute.xlu0 %175 }
  0x90   :  { %v181_v40 = vpop.permute.xlu1 %180 }
  0x92   :  { %v186_v50 = vpop.permute.xlu0 %185 }
  0x94   :  { %v191_v47 = vpop.permute.xlu1 %190 }
  0x96   :  { %v299_v62 = vpop.permute.xlu0 %298 }
  0x97   :  { %v304_v63 = vrot.slane %v299_v62, %v303_v61 }
  0xd9   :  { %v425_v20 = vpop.f32.mrb[0].mxu0 }
  0xda   :  { %v152_v21 = vadd.f32 %v425_v20, %v51_v19  ;;  %v146_v22 = vpop.f32.mrb[1].mxu0 }
  0xdb   :  { %v147_v23 = vadd.f32 %v146_v22, %v46_v17 }
  0xdc   :  { %v166_v24 = vmax.f32 %v152_v21, 0.0 }
  0xdd   :  { %v165_v26 = vmax.f32 %v147_v23, 0.0  ;;  %v428_v27 = vpop.f32.mrb[2].mxu0 }
  0xde   :  { %v162_v28 = vadd.f32 %v428_v27, %v61_v25  ;;  %v156_v29 = vpop.f32.mrb[3].mxu0 }
  0xdf   :  { %v157_v30 = vadd.f32 %v156_v29, %v56_v18  ;;  %v454_v31 = vpack.c.bf16 %v166_v24, %v165_v26 }
  0xe0   :  { %v168_v32 = vmax.f32 %v162_v28, 0.0 }
  0xe1   :  { %v167_v33 = vmax.f32 %v157_v30, 0.0  ;;  %455 = vmatprep.subr.bf16.mxu1 %v454_v31 }
  0xe2   :  { %457 = vmatpush3.bf16.msra.mxu1 %v454_v31 }
  0xe3   :  { %v458_v34 = vpack.c.bf16 %v168_v32, %v167_v33 }
  0xe5   :  { %459 = vmatprep.subr.bf16.mxu1 %v458_v34 }
  0xe6   :  { %461 = vmatpush3.bf16.msra.mxu1 %v458_v34 }
  0xe9   :  { %438 = vmatmul.mubr.msk.f32.vlgmr.msra.gmra.mrb[0].mxu1 %vm193_vm2, %v170_v35 }
  0xea   :  { %440 = vmatprep.mubr.msk.f32.mxu1 %vm193_vm2, %v171_v36 }
  0xed   :  { %441 = vmatmul.mubr.msk.f32.gmra.mrb[2].mxu1 %vm193_vm2, %v172_v37 }
 0x1bc   :  { %v439_v42 = vpop.f32.mrb[0].mxu1 }
 0x1bd   :  { %v278_v43 = vadd.f32 %v439_v42, %v181_v40  ;;  %v272_v44 = vpop.f32.mrb[1].mxu1 }
 0x1be   :  { %v273_v45 = vadd.f32 %v272_v44, %v176_v41 }
 0x1bf   :  { %v292_v46 = vmax.f32 %v278_v43, 0.0 }
 0x1c0   :  { %v291_v48 = vmax.f32 %v273_v45, 0.0  ;;  %v442_v49 = vpop.f32.mrb[2].mxu1 }
 0x1c1   :  { %v288_v51 = vadd.f32 %v442_v49, %v191_v47  ;;  %v282_v52 = vpop.f32.mrb[3].mxu1 }
 0x1c2   :  { %v463_v53 = vpack.c.bf16 %v292_v46, %v291_v48  ;;  %v283_v54 = vadd.f32 %v282_v52, %v186_v50 }
 0x1c3   :  { %v294_v55 = vmax.f32 %v288_v51, 0.0 }
 0x1c4   :  { %v293_v56 = vmax.f32 %v283_v54, 0.0  ;;  %464 = vmatpush3.bf16.msra.mxu0 %v463_v53 }
 0x1c5   :  { %465 = vmatprep.subr.bf16.mxu0 %v500_v38 }
 0x1c6   :  { %v466_v57 = vpack.c.bf16 %v294_v55, %v293_v56 }
 0x1c8   :  { %467 = vmatpush3.bf16.msra.mxu0 %v466_v57 }
 0x1cb   :  { %452 = vmatmul.mubr.msk.f32.vlgmr.msra.gmra.mrb[4].mxu0 %vm193_vm2, %v295_v58 }
 0x29e   :  { %v374_v0 = vpop.f32.mrb[4].mxu0 }
 0x29f   :  { %v375_v1 = vadd.f32 %v374_v0, %v304_v63  ;;  %v453_v2 = vpop.f32.mrb[5].mxu0 }
 0x2a1   :  { %378 = vst [vmem:[#allocation3] sm:$0x1] %v375_v1 }
 0x2a2   :  { %486 = shalt.err (!%p483_p4)
}
 0x2a3   :  { %s487_s13 = scalar_lea.hbm %s629_s7, 16 }
 0x2a4   :  { %p488_p5 = scmp.ne.s32.totalorder %s629_s7, %s487_s13  ;;  %p491_p6 = scmp.lt.u32.totalorder %s487_s13, %s629_s7 }
 0x2a6   :  { %p493_p7 = pnand %p491_p6, %p488_p5 }
 0x2a8   :  { %496 = shalt.err (!%p493_p7)
}
 0x2a9   :  { %388 = dma.vmem_to_hbm [thread:$0]  %s386_s10, 16, %s629_s7, [#allocation4]  }
 0x2aa   :  { %497 = dma.done.wait [#allocation4], 16  }
 0x2ab   :  { %498 = vsyncadd [#allocation4], 4294967280 }
 0x2ac   :  { %392 = vsyncpa [#allocation4], 1 }

</bundles_post_ra>
